<compile_context>
chip_gen: v7x
topology: tpu7x:2x2x1
jax: 0.10.0
libtpu: 0.0.40
codegen_flags: <defaults>
</compile_context>

<pallas_src>
import jax
import jax.numpy as jnp
from jax import lax
from jax.experimental import pallas as pl
from jax.experimental.pallas import tpu as pltpu


def _round_up(n, m):
    return ((n + m - 1) // m) * m


def _mlp_logits(x_ref, w1_ref, b1_ref, w2_ref, b2_ref):
    """relu(x @ W1 + b1) @ W2 + b2 with fp32 MXU accumulation and fp32 biases."""
    x = x_ref[...].astype(w1_ref.dtype)               # in-kernel cast (free VPU filler)
    h = jnp.dot(x, w1_ref[...], preferred_element_type=jnp.float32)
    h = jnp.maximum(h + b1_ref[...], 0.0)             # (tb, H) + (1, H)
    o = jnp.dot(h.astype(w2_ref.dtype), w2_ref[...],
                preferred_element_type=jnp.float32)
    return o + b2_ref[...]                            # (tb, O) + (1, O), fp32


def mlp_kernel(x_ref, w1_ref, b1_ref, w2_ref, b2_ref, out_ref):
    out_ref[...] = _mlp_logits(
        x_ref, w1_ref, b1_ref, w2_ref, b2_ref).astype(out_ref.dtype)


def mlp_argmax_kernel(x_ref, w1_ref, b1_ref, w2_ref, b2_ref, idx_ref):
    # Fused logits + argmax: only (tb, 1) int32 per tile is written back.
    o = _mlp_logits(x_ref, w1_ref, b1_ref, w2_ref, b2_ref)       # (tb, O) fp32
    m = jnp.max(o, axis=1, keepdims=True)
    lane = lax.broadcasted_iota(jnp.int32, o.shape, 1)
    cand = jnp.where(o == m, lane, jnp.int32(o.shape[1]))        # sentinel > any idx
    idx_ref[...] = jnp.min(cand, axis=1, keepdims=True).astype(jnp.int32)


class ShallowNeuralNetwork:
    """Pallas-TPU equivalent of the torch module (Linear -> ReLU -> Linear)."""

    def __init__(self, w1, b1, w2, b2, *, compute_dtype=jnp.bfloat16, block_b=512):
        in_dim, hidden = w1.shape
        hid2, out_dim = w2.shape
        assert hid2 == hidden and b1.shape == (hidden,) and b2.shape == (out_dim,)
        self.in_dim, self.hidden, self.out_dim = in_dim, hidden, out_dim
        self.block_b = block_b
        # One-time parameter prep (hoisted out of the forward): MXU inputs in
        # compute_dtype (bf16 default for v6e/v7x), biases kept fp32.
        self.w1 = jnp.asarray(w1, compute_dtype)
        self.w2 = jnp.asarray(w2, compute_dtype)
        self.b1 = jnp.asarray(b1, jnp.float32).reshape(1, hidden)
        self.b2 = jnp.asarray(b2, jnp.float32).reshape(1, out_dim)

    # ---- tiling helpers -------------------------------------------------
    def _tile(self, B):
        tb = min(self.block_b, _round_up(B, 8))
        # Guarantee >= 2 grid steps when possible so the "parallel" batch axis
        # actually shards across both TensorCores on v7x.
        if pl.cdiv(B, tb) < 2 and B > 8:
            tb = _round_up(pl.cdiv(B, 2), 8)
        return tb

    def _vmem_limit(self, x, tb, out_feat, out_dtype):
        isz = lambda d: jnp.dtype(d).itemsize
        resident = (self.w1.size * isz(self.w1.dtype)
                    + self.w2.size * isz(self.w2.dtype)
                    + self.b1.size * 4 + self.b2.size * 4)
        streamed = tb * (self.in_dim * isz(x.dtype)
                         + out_feat * isz(out_dtype))
        live = tb * (self.hidden + self.out_dim) * 4          # fp32 h / logits
        need = 2 * streamed + 2 * resident + live             # double-buffered
        # Raise above v5e's 16 MiB scoped default; stay under v7x's 64 MiB.
        return int(min(max(2 * need, 32 * 1024 * 1024), 64 * 1024 * 1024))

    # ---- fused pallas_call ----------------------------------------------
    def _call(self, x, kernel, out_feat, out_dtype):
        B, in_dim = x.shape
        assert in_dim == self.in_dim
        tb = self._tile(B)
        grid = (pl.cdiv(B, tb),)

        isz = lambda d: jnp.dtype(d).itemsize
        flops = 2 * B * self.in_dim * self.hidden + 2 * B * self.hidden * self.out_dim
        bytes_accessed = (x.size * isz(x.dtype)
                          + self.w1.size * isz(self.w1.dtype)
                          + self.w2.size * isz(self.w2.dtype)
                          + (self.b1.size + self.b2.size) * 4
                          + B * out_feat * isz(out_dtype))

        return pl.pallas_call(
            kernel,
            out_shape=jax.ShapeDtypeStruct((B, out_feat), out_dtype),
            grid=grid,
            in_specs=[
                # x tile streams over the batch grid axis (partial last block
                # is masked on store; garbage stays confined to batch rows).
                pl.BlockSpec((tb, in_dim), lambda i: (i, 0)),
                # Weights / biases: constant index_map -> VMEM-resident.
                pl.BlockSpec(self.w1.shape, lambda i: (0, 0)),
                pl.BlockSpec(self.b1.shape, lambda i: (0, 0)),
                pl.BlockSpec(self.w2.shape, lambda i: (0, 0)),
                pl.BlockSpec(self.b2.shape, lambda i: (0, 0)),
            ],
            out_specs=pl.BlockSpec((tb, out_feat), lambda i: (i, 0)),
            compiler_params=pltpu.CompilerParams(
                dimension_semantics=("parallel",),
                vmem_limit_bytes=self._vmem_limit(x, tb, out_feat, out_dtype)),
            cost_estimate=pl.CostEstimate(flops=flops, transcendentals=0,
                                          bytes_accessed=bytes_accessed),
        )(x, self.w1, self.b1, self.w2, self.b2)

    def forward(self, x):
        return self._call(x, mlp_kernel, self.out_dim, x.dtype)

    __call__ = forward

    def predict(self, x):
        idx = self._call(x, mlp_argmax_kernel, 1, jnp.int32)
        return idx[:, 0]


if __name__ == "__main__":
    # Small shapes consistent with the module: batch=8, input=16, hidden=32, output=8
    B, INPUT, HIDDEN, OUTPUT = 8, 16, 32, 8

    key = jax.random.PRNGKey(0)
    kx, kw1, kb1, kw2, kb2 = jax.random.split(key, 5)

    x = jax.random.normal(kx, (B, INPUT), dtype=jnp.float32)
    # Deterministic param init (mimicking nn.Linear's uniform bound 1/sqrt(fan_in)).
    bound1 = 1.0 / (INPUT ** 0.5)
    bound2 = 1.0 / (HIDDEN ** 0.5)
    w1 = jax.random.uniform(kw1, (INPUT, HIDDEN), jnp.float32, -bound1, bound1)
    b1 = jax.random.uniform(kb1, (HIDDEN,), jnp.float32, -bound1, bound1)
    w2 = jax.random.uniform(kw2, (HIDDEN, OUTPUT), jnp.float32, -bound2, bound2)
    b2 = jax.random.uniform(kb2, (OUTPUT,), jnp.float32, -bound2, bound2)

    ref = jnp.maximum(x @ w1 + b1, 0.0) @ w2 + b2

    # fp32 MXU-input path: strict numerical check.
    model_f32 = ShallowNeuralNetwork(w1, b1, w2, b2, compute_dtype=jnp.float32)
    out_f32 = jax.block_until_ready(model_f32(x))
    assert out_f32.shape == (B, OUTPUT)
    assert jnp.allclose(out_f32, ref, atol=1e-5, rtol=1e-5)

    # bf16 MXU-input default (v6e/v7x recommendation): fp32 accumulate, looser check.
    model_bf16 = ShallowNeuralNetwork(w1, b1, w2, b2)
    out_bf16 = jax.block_until_ready(model_bf16(x))
    assert out_bf16.shape == (B, OUTPUT)
    assert jnp.allclose(out_bf16, ref, atol=5e-2, rtol=5e-2)

    # Fused logits + argmax predict (no padded-logits writeback).
    preds = jax.block_until_ready(model_f32.predict(x))
    assert preds.shape == (B,)
    assert jnp.array_equal(preds, jnp.argmax(ref, axis=1))

    print("KERNEL_OK")
</pallas_src>

<mosaic_0001>
module attributes {stable_mosaic.version = 11 : i64} {
  func.func @mlp_kernel(%arg0: i32, %arg1: memref<8x16xf32, #tpu.memory_space<vmem>>, %arg2: memref<16x32xf32, #tpu.memory_space<vmem>>, %arg3: memref<1x32xf32, #tpu.memory_space<vmem>>, %arg4: memref<32x8xf32, #tpu.memory_space<vmem>>, %arg5: memref<1x8xf32, #tpu.memory_space<vmem>>, %arg6: memref<8x8xf32, #tpu.memory_space<vmem>>) attributes {dimension_semantics = [#tpu.dimension_semantics<parallel>], iteration_bounds = array<i64: 1>, scalar_prefetch = 0 : i64, scratch_operands = 0 : i64, tpu.core_type = #tpu.core_type<tc>, window_params = [{transform_indices = @transform_0, window_bounds = array<i64: 8, 16>}, {pipeline_mode = #tpu.pipeline_mode<synchronous>, transform_indices = @transform_1, window_bounds = array<i64: 16, 32>}, {pipeline_mode = #tpu.pipeline_mode<synchronous>, transform_indices = @transform_2, window_bounds = array<i64: 1, 32>}, {pipeline_mode = #tpu.pipeline_mode<synchronous>, transform_indices = @transform_3, window_bounds = array<i64: 32, 8>}, {pipeline_mode = #tpu.pipeline_mode<synchronous>, transform_indices = @transform_4, window_bounds = array<i64: 1, 8>}, {transform_indices = @transform_5, window_bounds = array<i64: 8, 8>}]} {
    %c0 = arith.constant 0 : index
    %c0_0 = arith.constant 0 : index
    %0 = vector.load %arg1[%c0, %c0_0] : memref<8x16xf32, #tpu.memory_space<vmem>>, vector<8x16xf32>
    %c0_1 = arith.constant 0 : index
    %c0_2 = arith.constant 0 : index
    %1 = vector.load %arg2[%c0_1, %c0_2] : memref<16x32xf32, #tpu.memory_space<vmem>>, vector<16x32xf32>
    %cst = arith.constant dense<0.000000e+00> : vector<8x32xf32>
    %2 = tpu.matmul %0, %1, %cst {dimension_numbers = #tpu.dot_dimension_numbers<[1], [0], [0], [1], [0, 0, 1, 1], [], []>} : vector<8x16xf32>, vector<16x32xf32>, vector<8x32xf32> -> vector<8x32xf32>
    %c0_3 = arith.constant 0 : index
    %c0_4 = arith.constant 0 : index
    %3 = vector.load %arg3[%c0_3, %c0_4] : memref<1x32xf32, #tpu.memory_space<vmem>>, vector<1x32xf32>
    %4 = vector.broadcast %3 : vector<1x32xf32> to vector<8x32xf32>
    %5 = arith.addf %2, %4 : vector<8x32xf32>
    %cst_5 = arith.constant 0.000000e+00 : f32
    %6 = vector.broadcast %cst_5 : f32 to vector<8x32xf32>
    %7 = arith.maximumf %5, %6 : vector<8x32xf32>
    %c0_6 = arith.constant 0 : index
    %c0_7 = arith.constant 0 : index
    %8 = vector.load %arg4[%c0_6, %c0_7] : memref<32x8xf32, #tpu.memory_space<vmem>>, vector<32x8xf32>
    %cst_8 = arith.constant dense<0.000000e+00> : vector<8x8xf32>
    %9 = tpu.matmul %7, %8, %cst_8 {dimension_numbers = #tpu.dot_dimension_numbers<[1], [0], [0], [1], [0, 0, 1, 1], [], []>} : vector<8x32xf32>, vector<32x8xf32>, vector<8x8xf32> -> vector<8x8xf32>
    %c0_9 = arith.constant 0 : index
    %c0_10 = arith.constant 0 : index
    %10 = vector.load %arg5[%c0_9, %c0_10] : memref<1x8xf32, #tpu.memory_space<vmem>>, vector<1x8xf32>
    %11 = vector.broadcast %10 : vector<1x8xf32> to vector<8x8xf32>
    %12 = arith.addf %9, %11 : vector<8x8xf32>
    %c0_11 = arith.constant 0 : index
    %c0_12 = arith.constant 0 : index
    %13 = vector.load %arg6[%c0_11, %c0_12] : memref<8x8xf32, #tpu.memory_space<vmem>>, vector<8x8xf32>
    tpu.vector_store %arg6[%c0_11, %c0_12], %12 {strides = array<i32>} : memref<8x8xf32, #tpu.memory_space<vmem>>, vector<8x8xf32>,
    return
  }
  func.func @transform_0(%arg0: i32) -> (i32, i32) {
    %c0_i32 = arith.constant 0 : i32
    %c0_i32_0 = arith.constant 0 : i32
    return %arg0, %c0_i32 : i32, i32
  }
  func.func @transform_1(%arg0: i32) -> (i32, i32) {
    %c0_i32 = arith.constant 0 : i32
    %c0_i32_0 = arith.constant 0 : i32
    %c0_i32_1 = arith.constant 0 : i32
    return %c0_i32, %c0_i32_0 : i32, i32
  }
  func.func @transform_2(%arg0: i32) -> (i32, i32) {
    %c0_i32 = arith.constant 0 : i32
    %c0_i32_0 = arith.constant 0 : i32
    %c0_i32_1 = arith.constant 0 : i32
    return %c0_i32, %c0_i32_0 : i32, i32
  }
  func.func @transform_3(%arg0: i32) -> (i32, i32) {
    %c0_i32 = arith.constant 0 : i32
    %c0_i32_0 = arith.constant 0 : i32
    %c0_i32_1 = arith.constant 0 : i32
    return %c0_i32, %c0_i32_0 : i32, i32
  }
  func.func @transform_4(%arg0: i32) -> (i32, i32) {
    %c0_i32 = arith.constant 0 : i32
    %c0_i32_0 = arith.constant 0 : i32
    %c0_i32_1 = arith.constant 0 : i32
    return %c0_i32, %c0_i32_0 : i32, i32
  }
  func.func @transform_5(%arg0: i32) -> (i32, i32) {
    %c0_i32 = arith.constant 0 : i32
    %c0_i32_0 = arith.constant 0 : i32
    return %arg0, %c0_i32 : i32, i32
  }
}

</mosaic_0001>

<bundles_post_ra>
// kernel: tpu_custom_call.1
= control target key start
LH: loop header
LB: loop body
LE: loop exit
PB: predicated region body
PF: predicated region fallthrough
CT: control target
= control target key end

     0   :  { %v274_v2 = vmov 0.0|0.0   ;;  %vm275_vm0 = vmmov 0   ;;  %v276_v4 = vmov 0.0   ;;  %s347_s0 = inlined_call_operand.vmem [shape: f32[8,16], index: 0, kind: input, shape index: {}]   ;;  %s348_s1 = inlined_call_operand.vmem [shape: f32[16,32], index: 1, kind: input, shape index: {}]   ;;  %s349_s2 = inlined_call_operand.vmem [shape: f32[1,32], index: 2, kind: input, shape index: {}]   ;;  %s350_s3 = inlined_call_operand.vmem [shape: f32[32,8], index: 3, kind: input, shape index: {}]   ;;  %s351_s4 = inlined_call_operand.vmem [shape: f32[1,8], index: 4, kind: input, shape index: {}]   ;;  %s352_s5 = inlined_call_operand.hbm [shape: f32[8,8], index: 5, kind: output, shape index: {}]  }
   0x1   :  { %v22_v0 = vld [vmem:[%s348_s1] sm:$0xff]  ;;  %v23_v1 = vld [vmem:[%s348_s1 + $0x8] sm:$0xff]  ;;  %237 = vmatprep.subr.bf16.mxu0 %v274_v2  ;;  %223 = vmatprep.mubr.msk.f32.mxu0 %vm275_vm0, %v276_v4 }
   0x2   :  { %v238_v3 = vpack.c.bf16 %v23_v1, %v22_v0  ;;  %v106_v5 = vld [vmem:[%s350_s3] sm:$0xff]  ;;  %v107_v6 = vld [vmem:[%s350_s3 + $0x8] sm:$0xff]  ;;  %240 = vmatprep.subr.bf16.mxu1 %v274_v2  ;;  %234 = vmatprep.mubr.msk.f32.mxu1 %vm275_vm0, %v276_v4 }
   0x3   :  { %v241_v7 = vpack.c.bf16 %v107_v6, %v106_v5 }
   0x4   :  { %10 = vsyncpa [#allocation3], 0  ;;  %239 = vmatpush3.bf16.msra.mxu0 %v238_v3  ;;  %v21_v8 = vld [vmem:[%s347_s0] sm:$0xff]  ;;  %vm31_vm1 = vcmask 130048   ;;  %v108_v9 = vld [vmem:[%s350_s3 + $0x10] sm:$0xff]  ;;  %vm117_vm2 = vcmask 261120  }
   0x5   :  { %242 = vmatpush3.bf16.msra.mxu1 %v241_v7  ;;  %v109_v10 = vld [vmem:[%s350_s3 + $0x18] sm:$0xff]  ;;  %v207_v12 = vld [vmem:[%s349_s2] ss:$0 sm:$0xff]  ;;  %s277_s9 = smov [#allocation2]   ;;  %vm191_vm3 = vcmask 64512  }
   0x6   :  { %243 = vmatprep.subr.bf16.mxu1 %v274_v2  ;;  %v244_v11 = vpack.c.bf16 %v109_v10, %v108_v9  ;;  %v209_v17 = vld [vmem:[%s351_s4] ss:$0 sm:$0xff]  ;;  %s199_s10 = sshll.u32 %s277_s9, 4  ;;  %s200_s10 = int_to_ptr.vmem [resolvable:$true] %s199_s10 }
   0x7   :  { %224 = vmatmul.mubr.msk.f32.vlgmr.msra.gmra.mrb[0].mxu0 %vm31_vm1, %v21_v8  ;;  %s250_s3 = scalar_lea.vmem %s200_s10, 128  ;;  %p255_p1 = scmp.lt.s32.totalorder %s200_s10, %s200_s10 }
   0x8   :  { %p251_p0 = scmp.ne.s32.totalorder %s200_s10, %s250_s3  ;;  %p256_p2 = scmp.lt.s32.totalorder %s250_s3, %s250_s3 }
   0x9   :  { %245 = vmatpush3.bf16.msra.mxu1 %v244_v11 }
   0xa   :  { %p257_p3 = por %p256_p2, %p255_p1 }
   0xc   :  { %p258_p4 = pnand %p257_p3, %p251_p0 }
  0xda   :  { %v101_v13 = vpop.f32.mrb[0].mxu0 }
  0xdb   :  { %v102_v14 = vadd.f32 %v207_v12, %v101_v13  ;;  %v225_v15 = vpop.f32.mrb[1].mxu0 }
  0xdd   :  { %v105_v16 = vmax.f32 %v102_v14, 0.0 }
  0xdf   :  { %235 = vmatmul.mubr.msk.f32.vlgmr.msra.gmra.mrb[0].mxu1 %vm117_vm2, %v105_v16 }
 0x1b2   :  { %v187_v18 = vpop.f32.mrb[0].mxu1 }
 0x1b3   :  { %v188_v19 = vadd.f32 %v209_v17, %v187_v18  ;;  %v236_v20 = vpop.f32.mrb[1].mxu1 }
 0x1b5   :  { %192 = vst.msk [vmem:[#allocation2] sm:$0xff] %vm191_vm3, %v188_v19 }
 0x1b6   :  { %261 = shalt.err (!%p258_p4)
}
 0x1b7   :  { %s262_s12 = scalar_lea.hbm %s352_s5, 128 }
 0x1b8   :  { %p263_p5 = scmp.ne.s32.totalorder %s352_s5, %s262_s12  ;;  %p266_p6 = scmp.lt.u32.totalorder %s262_s12, %s352_s5 }
 0x1ba   :  { %p268_p7 = pnand %p266_p6, %p263_p5 }
 0x1bc   :  { %271 = shalt.err (!%p268_p7)
}
 0x1bd   :  { %202 = dma.vmem_to_hbm [thread:$0]  %s200_s10, 128, %s352_s5, [#allocation3]  }
 0x1be   :  { %272 = dma.done.wait [#allocation3], 128  }
 0x1bf   :  { %273 = vsyncadd [#allocation3], 4294967168 }
 0x1c0   :  { %206 = vsyncpa [#allocation3], 1 }

</bundles_post_ra>
